<compile_context>
chip_gen: v5e
topology: v5e:2x2
jax: 0.10.0
libtpu: 0.0.40
codegen_flags: <defaults>
</compile_context>

<pallas_src>
import numpy as np
import jax
import jax.numpy as jnp
from jax.experimental import pallas as pl
from jax.experimental.pallas import tpu as pltpu

NEURONS = 3
P_INITIAL = 0.5
LANES = 128   # lane-padded neuron axis (neuron i on lanes)


def _btype_kernel(ab_ref, x_ref, out_ref):
    """new_states = a + b * x_next on a single lane-dense vreg.

    ab_ref : (2, LANES)  row 0 = a[i] = 1 - intermediate[i]
                          row 1 = b[i] = blockC[i] * intermediate[i]
    x_ref  : (1, LANES)  x_flat[(i+1) % N] per neuron lane i (pad lanes: don't care)
    out_ref: (1, LANES)  new_states[i], lane-dense unmasked store
    """
    out_ref[...] = ab_ref[0:1, :] + ab_ref[1:2, :] * x_ref[...]


def make_bi_type_forward(adj, states, block_c):
    """Build a jitted forward(x) for a fixed network (adj, states, block C-state).

    All static algebra (the intermediate[] product over adj/states) is folded
    once here in NumPy and baked into a (2, LANES) constant slab; per-call work
    is x-dependent only (reshape + slice + pad + one pallas_call).
    """
    adj = np.asarray(adj, np.float32)
    states = np.asarray(states, np.float32)
    block_c = np.asarray(block_c, np.float32)
    n = adj.shape[0]
    if n > LANES:
        raise ValueError(f"neurons={n} exceeds single-tile lane limit {LANES}")

    # ---- compile-time fold of the static network algebra ----
    term = 1.0 - adj + adj * states[None, :]          # (n, n)
    intermediate = 1.0 - np.prod(term, axis=1)        # (n,)
    a = 1.0 - intermediate                            # new = a + b * x_next
    b = block_c * intermediate
    ab_pad = np.zeros((2, LANES), np.float32)         # zero pad => b==0 on pad lanes
    ab_pad[0, :n] = a
    ab_pad[1, :n] = b
    ab_const = jnp.asarray(ab_pad)

    vmem = pl.BlockSpec(memory_space=pltpu.MemorySpace.VMEM)
    call = pl.pallas_call(
        _btype_kernel,
        out_shape=jax.ShapeDtypeStruct((1, LANES), jnp.float32),
        in_specs=[vmem, vmem],
        out_specs=vmem,
    )

    @jax.jit
    def forward(x):
        x_flat = jnp.reshape(x, (-1,)).astype(jnp.float32)
        N = x_flat.shape[0]
        if n < N:
            # (i+1) % N never wraps: contiguous slice, no gather / no DUS.
            x_next = x_flat[1:n + 1]
        else:
            # Rare wrap case (n >= N): trace-time-constant indices, one take.
            idx = np.arange(1, n + 1) % N
            x_next = jnp.take(x_flat, jnp.asarray(idx))
        x_row = jnp.pad(x_next, (0, LANES - n))[None, :]      # (1, LANES)
        out = call(ab_const, x_row)
        return out[0, :n]

    return forward


def reference_forward(x, adj, states, block_c):
    """Pure NumPy mirror of the PyTorch forward (unfused formula) for checking."""
    x_flat = np.asarray(x, np.float32).reshape(-1)
    N = x_flat.shape[0]
    n = adj.shape[0]
    term = 1.0 - adj + adj * states[None, :]
    intermediate = 1.0 - np.prod(term, axis=1)
    new = np.empty(n, np.float32)
    for i in range(n):
        c_temp = 1.0 - block_c[i] * x_flat[(i + 1) % N]
        new[i] = 1.0 - c_temp * intermediate[i]
    return new


def init_params(neurons=NEURONS, p_initial=P_INITIAL, seed=0):
    """Deterministic stand-in for BITypeNetwork.__init__ randomness."""
    rng = np.random.RandomState(seed)
    adj = np.zeros((neurons, neurons), np.float32)
    for i in range(neurons):
        cols = rng.choice(neurons, 2, replace=False)
        adj[i, cols] = 1.0
    states = rng.choice([0, 1], size=(neurons,),
                        p=[p_initial, 1 - p_initial]).astype(np.float32)
    # Each BTypeBlock owns a 3-vector of states; only index 2 (C) affects the
    # value forward() returns, so that is all we carry.
    block_c = rng.choice([0, 1], size=(neurons,),
                         p=[p_initial, 1 - p_initial]).astype(np.float32)
    # self.W = ones(neurons) exists in the module but is unused in forward().
    return adj, states, block_c


if __name__ == "__main__":
    adj_np, states_np, block_c_np = init_params()

    key = jax.random.PRNGKey(0)
    x = jax.random.uniform(key, (2, 4), dtype=jnp.float32)  # flattened -> N=8

    forward = make_bi_type_forward(adj_np, states_np, block_c_np)
    out = jax.block_until_ready(forward(x))

    ref = reference_forward(np.asarray(x), adj_np, states_np, block_c_np)
    np.testing.assert_allclose(np.asarray(out), ref, rtol=1e-6, atol=1e-6)
    print("KERNEL_OK")
</pallas_src>

<mosaic_0001>
module attributes {stable_mosaic.version = 11 : i64} {
  func.func @_btype_kernel(%arg0: memref<2x128xf32, #tpu.memory_space<vmem>>, %arg1: memref<1x128xf32, #tpu.memory_space<vmem>>, %arg2: memref<1x128xf32, #tpu.memory_space<vmem>>) attributes {dimension_semantics = [], scalar_prefetch = 0 : i64, scratch_operands = 0 : i64, tpu.core_type = #tpu.core_type<tc>} {
    %c0 = arith.constant 0 : index
    %c0_0 = arith.constant 0 : index
    %0 = vector.load %arg0[%c0, %c0_0] : memref<2x128xf32, #tpu.memory_space<vmem>>, vector<1x128xf32>
    %c1 = arith.constant 1 : index
    %c0_1 = arith.constant 0 : index
    %1 = vector.load %arg0[%c1, %c0_1] : memref<2x128xf32, #tpu.memory_space<vmem>>, vector<1x128xf32>
    %c0_2 = arith.constant 0 : index
    %c0_3 = arith.constant 0 : index
    %2 = vector.load %arg1[%c0_2, %c0_3] : memref<1x128xf32, #tpu.memory_space<vmem>>, vector<1x128xf32>
    %3 = arith.mulf %1, %2 : vector<1x128xf32>
    %4 = arith.addf %0, %3 : vector<1x128xf32>
    %c0_4 = arith.constant 0 : index
    %c0_5 = arith.constant 0 : index
    %5 = vector.load %arg2[%c0_4, %c0_5] : memref<1x128xf32, #tpu.memory_space<vmem>>, vector<1x128xf32>
    tpu.vector_store %arg2[%c0_4, %c0_5], %4 {strides = array<i32>} : memref<1x128xf32, #tpu.memory_space<vmem>>, vector<1x128xf32>,
    return
  }
}

</mosaic_0001>

<bundles_post_ra>
// kernel: forward.1
= control target key start
LH: loop header
LB: loop body
LE: loop exit
PB: predicated region body
PF: predicated region fallthrough
CT: control target
= control target key end

     0   :  { %s48_s0 = inlined_call_operand.vmem [shape: f32[2,128], index: 0, kind: input, shape index: {}]   ;;  %s49_s1 = inlined_call_operand.vmem [shape: f32[1,128], index: 1, kind: input, shape index: {}]   ;;  %s50_s2 = inlined_call_operand.vmem [shape: f32[1,128], index: 2, kind: output, shape index: {}]  }
   0x1   :  { %v11_v0 = vld [vmem:[%s48_s0] sm:$0x1]  ;;  %v12_v1 = vld [vmem:[%s48_s0 + $0x1] sm:$0x1] }
   0x2   :  { %v13_v2 = vld [vmem:[%s49_s1] sm:$0x1] }
   0x3   :  { %v14_v3 = vmul.f32 %v13_v2, %v12_v1 }
   0x5   :  { %v15_v4 = vadd.f32 %v14_v3, %v11_v0 }
   0x7   :  { %16 = vst [vmem:[%s50_s2] sm:$0x1] %v15_v4 }

</bundles_post_ra>
